<compile_context>
chip_gen: v7x
topology: tpu7x:2x2x1
jax: 0.10.0
libtpu: 0.0.40
codegen_flags: <defaults>
</compile_context>

<pallas_src>
import functools

import jax
import jax.numpy as jnp
from jax import lax
from jax.experimental import pallas as pl
from jax.experimental.pallas import tpu as pltpu

LN_EPS = 1e-5  # torch.nn.LayerNorm default


def _round_up(x: int, m: int) -> int:
    return (x + m - 1) // m * m


def prenorm_linear_kernel(x_ref, w_ref, b_ref, o_ref, *, d_true: int):
    """Fused LayerNorm(dim) + Linear for one TN-row tile.

    x_ref: (TN, Dp)  activation tile (zero-padded beyond d_true lanes)
    w_ref: (Dp, Hp)  folded weight  W' = diag(gamma) @ W  (bf16, zero-padded)
    b_ref: (1,  Hp)  folded bias    b' = beta @ W + b     (f32,  zero-padded)
    o_ref: (TN, Hp)
    """
    x = x_ref[...].astype(jnp.float32)

    # One-pass row statistics over the true (unpadded) feature count.
    # Padded lanes are zero so they contribute nothing to the sums.
    inv_d = 1.0 / float(d_true)
    s = jnp.sum(x, axis=-1, keepdims=True)
    ss = jnp.sum(x * x, axis=-1, keepdims=True)
    mean = s * inv_d
    var = jnp.maximum(ss * inv_d - mean * mean, 0.0)
    inv = lax.rsqrt(var + LN_EPS)
    xn = (x - mean) * inv  # affine is folded into W'/b'

    # bf16 x bf16 -> f32 MXU matmul. Padded D rows of W' are zero, so the
    # (garbage-valued) padded lanes of xn contribute nothing.
    out = jnp.dot(xn.astype(jnp.bfloat16), w_ref[...],
                  preferred_element_type=jnp.float32)
    out = out + b_ref[...].astype(jnp.float32)
    o_ref[...] = out.astype(o_ref.dtype)


def prenorm(x, gamma, beta, w, b, *, block_rows: int = 256):
    """PreNorm(dim, Linear(dim, hidden)): x (B,S,D) -> (B,S,H).

    gamma, beta: (D,) LayerNorm affine;  w: (D,H);  b: (H,)
    """
    B, S, D = x.shape
    H = w.shape[1]
    N = B * S

    # Fold LayerNorm affine into the Linear (done once on the small weight):
    #   (xc*inv*gamma + beta) @ W + b == (xc*inv) @ (gamma[:,None]*W) + (beta@W + b)
    w_fold = (gamma.astype(jnp.float32)[:, None] * w.astype(jnp.float32))
    b_fold = (beta.astype(jnp.float32) @ w.astype(jnp.float32)
              + b.astype(jnp.float32)).reshape(1, H)

    # Lane-dense padding of the feature axes.
    Dp = _round_up(D, 128)
    Hp = _round_up(H, 128)

    # Row tiling: TN rows per grid step (sublane-aligned), rows padded to TN.
    TN = min(block_rows, _round_up(N, 8))
    Np = _round_up(N, TN)

    x2 = jnp.pad(x.reshape(N, D), ((0, Np - N), (0, Dp - D)))
    wp = jnp.pad(w_fold, ((0, Dp - D), (0, Hp - H))).astype(jnp.bfloat16)
    bp = jnp.pad(b_fold, ((0, 0), (0, Hp - H)))

    grid = (Np // TN,)

    # Only raise the scoped-VMEM limit when the tiles actually need it
    # (keeps this safe on v7x's 64 MiB physical and v5e's 16 MiB default).
    est_bytes = (2 * TN * Dp * x2.dtype.itemsize        # x double-buffer
                 + 2 * TN * Hp * x.dtype.itemsize        # out double-buffer
                 + 2 * Dp * Hp * 2                       # resident bf16 weight
                 + 2 * Hp * 4)                           # bias
    cp_kwargs = dict(dimension_semantics=("parallel",))
    if est_bytes > 30 * 1024 * 1024:
        cp_kwargs["vmem_limit_bytes"] = min(int(est_bytes * 1.25),
                                            100 * 1024 * 1024)

    kernel = functools.partial(prenorm_linear_kernel, d_true=D)

    out = pl.pallas_call(
        kernel,
        out_shape=jax.ShapeDtypeStruct((Np, Hp), x.dtype),
        grid=grid,
        in_specs=[
            pl.BlockSpec((TN, Dp), lambda i: (i, 0)),   # streamed activations
            pl.BlockSpec((Dp, Hp), lambda i: (0, 0)),   # resident folded weight
            pl.BlockSpec((1, Hp), lambda i: (0, 0)),    # resident folded bias
        ],
        out_specs=pl.BlockSpec((TN, Hp), lambda i: (i, 0)),
        compiler_params=pltpu.CompilerParams(**cp_kwargs),
    )(x2, wp, bp)

    return out[:N, :H].reshape(B, S, H)


def prenorm_ref(x, gamma, beta, w, b):
    """Pure-JAX f32 reference (matches torch PreNorm(dim, nn.Linear(dim, H)))."""
    xf = x.astype(jnp.float32)
    mean = jnp.mean(xf, axis=-1, keepdims=True)
    var = jnp.mean((xf - mean) ** 2, axis=-1, keepdims=True)
    y = (xf - mean) * lax.rsqrt(var + LN_EPS) * gamma + beta
    return (y @ w + b).astype(x.dtype)


if __name__ == "__main__":
    # Small transformer-ish shapes: batch=2, seq=8, dim=32, hidden=32.
    # (The wrapper pads dim/hidden to 128 lanes internally.)
    B, S, D, H = 2, 8, 32, 32

    key = jax.random.PRNGKey(0)
    kx, kg, kb, kw, kbias = jax.random.split(key, 5)

    x = jax.random.normal(kx, (B, S, D), dtype=jnp.float32)
    gamma = 1.0 + 0.1 * jax.random.normal(kg, (D,), dtype=jnp.float32)
    beta = 0.1 * jax.random.normal(kb, (D,), dtype=jnp.float32)
    w = jax.random.normal(kw, (D, H), dtype=jnp.float32) / jnp.sqrt(D)
    b = 0.1 * jax.random.normal(kbias, (H,), dtype=jnp.float32)

    out = prenorm(x, gamma, beta, w, b)
    jax.block_until_ready(out)

    ref = prenorm_ref(x, gamma, beta, w, b)
    assert out.shape == (B, S, H), out.shape
    # bf16 GEMM operands with f32 accumulation -> looser tolerance than pure f32.
    assert jnp.allclose(out, ref, atol=2e-2, rtol=2e-2), \
        float(jnp.max(jnp.abs(out - ref)))

    print("KERNEL_OK")
</pallas_src>

<mosaic_0001>
module attributes {stable_mosaic.version = 11 : i64} {
  func.func @prenorm_linear_kernel(%arg0: i32, %arg1: memref<16x128xf32, #tpu.memory_space<vmem>>, %arg2: memref<128x128xbf16, #tpu.memory_space<vmem>>, %arg3: memref<1x128xf32, #tpu.memory_space<vmem>>, %arg4: memref<16x128xf32, #tpu.memory_space<vmem>>) attributes {dimension_semantics = [#tpu.dimension_semantics<parallel>], iteration_bounds = array<i64: 1>, scalar_prefetch = 0 : i64, scratch_operands = 0 : i64, tpu.core_type = #tpu.core_type<tc>, window_params = [{transform_indices = @transform_0, window_bounds = array<i64: 16, 128>}, {pipeline_mode = #tpu.pipeline_mode<synchronous>, transform_indices = @transform_1, window_bounds = array<i64: 128, 128>}, {pipeline_mode = #tpu.pipeline_mode<synchronous>, transform_indices = @transform_2, window_bounds = array<i64: 1, 128>}, {transform_indices = @transform_3, window_bounds = array<i64: 16, 128>}]} {
    %c0 = arith.constant 0 : index
    %c0_0 = arith.constant 0 : index
    %0 = vector.load %arg1[%c0, %c0_0] : memref<16x128xf32, #tpu.memory_space<vmem>>, vector<16x128xf32>
    %cst = arith.constant dense<0.000000e+00> : vector<16xf32>
    %1 = vector.multi_reduction <add>, %0, %cst [1] : vector<16x128xf32> to vector<16xf32>
    %2 = vector.shape_cast %1 : vector<16xf32> to vector<16x1xf32>
    %3 = arith.mulf %0, %0 : vector<16x128xf32>
    %cst_1 = arith.constant dense<0.000000e+00> : vector<16xf32>
    %4 = vector.multi_reduction <add>, %3, %cst_1 [1] : vector<16x128xf32> to vector<16xf32>
    %5 = vector.shape_cast %4 : vector<16xf32> to vector<16x1xf32>
    %cst_2 = arith.constant 3.125000e-02 : f32
    %6 = vector.broadcast %cst_2 : f32 to vector<16x1xf32>
    %7 = arith.mulf %2, %6 : vector<16x1xf32>
    %cst_3 = arith.constant 3.125000e-02 : f32
    %8 = vector.broadcast %cst_3 : f32 to vector<16x1xf32>
    %9 = arith.mulf %5, %8 : vector<16x1xf32>
    %10 = arith.mulf %7, %7 : vector<16x1xf32>
    %11 = arith.subf %9, %10 : vector<16x1xf32>
    %cst_4 = arith.constant 0.000000e+00 : f32
    %12 = vector.broadcast %cst_4 : f32 to vector<16x1xf32>
    %13 = arith.maximumf %11, %12 : vector<16x1xf32>
    %cst_5 = arith.constant 9.99999974E-6 : f32
    %14 = vector.broadcast %cst_5 : f32 to vector<16x1xf32>
    %15 = arith.addf %13, %14 : vector<16x1xf32>
    %16 = math.rsqrt %15 : vector<16x1xf32>
    %17 = vector.broadcast %7 : vector<16x1xf32> to vector<16x128xf32>
    %18 = arith.subf %0, %17 : vector<16x128xf32>
    %19 = vector.broadcast %16 : vector<16x1xf32> to vector<16x128xf32>
    %20 = arith.mulf %18, %19 : vector<16x128xf32>
    %21 = arith.truncf %20 : vector<16x128xf32> to vector<16x128xbf16>
    %c0_6 = arith.constant 0 : index
    %c0_7 = arith.constant 0 : index
    %22 = vector.load %arg2[%c0_6, %c0_7] : memref<128x128xbf16, #tpu.memory_space<vmem>>, vector<128x128xbf16>
    %cst_8 = arith.constant dense<0.000000e+00> : vector<16x128xf32>
    %23 = tpu.matmul %21, %22, %cst_8 {dimension_numbers = #tpu.dot_dimension_numbers<[1], [0], [0], [1], [0, 0, 1, 1], [], []>} : vector<16x128xbf16>, vector<128x128xbf16>, vector<16x128xf32> -> vector<16x128xf32>
    %c0_9 = arith.constant 0 : index
    %c0_10 = arith.constant 0 : index
    %24 = vector.load %arg3[%c0_9, %c0_10] : memref<1x128xf32, #tpu.memory_space<vmem>>, vector<1x128xf32>
    %25 = vector.broadcast %24 : vector<1x128xf32> to vector<16x128xf32>
    %26 = arith.addf %23, %25 : vector<16x128xf32>
    %c0_11 = arith.constant 0 : index
    %c0_12 = arith.constant 0 : index
    %27 = vector.load %arg4[%c0_11, %c0_12] : memref<16x128xf32, #tpu.memory_space<vmem>>, vector<16x128xf32>
    tpu.vector_store %arg4[%c0_11, %c0_12], %26 {strides = array<i32>} : memref<16x128xf32, #tpu.memory_space<vmem>>, vector<16x128xf32>,
    return
  }
  func.func @transform_0(%arg0: i32) -> (i32, i32) {
    %c0_i32 = arith.constant 0 : i32
    %c0_i32_0 = arith.constant 0 : i32
    return %arg0, %c0_i32 : i32, i32
  }
  func.func @transform_1(%arg0: i32) -> (i32, i32) {
    %c0_i32 = arith.constant 0 : i32
    %c0_i32_0 = arith.constant 0 : i32
    %c0_i32_1 = arith.constant 0 : i32
    return %c0_i32, %c0_i32_0 : i32, i32
  }
  func.func @transform_2(%arg0: i32) -> (i32, i32) {
    %c0_i32 = arith.constant 0 : i32
    %c0_i32_0 = arith.constant 0 : i32
    %c0_i32_1 = arith.constant 0 : i32
    return %c0_i32, %c0_i32_0 : i32, i32
  }
  func.func @transform_3(%arg0: i32) -> (i32, i32) {
    %c0_i32 = arith.constant 0 : i32
    %c0_i32_0 = arith.constant 0 : i32
    return %arg0, %c0_i32 : i32, i32
  }
}

</mosaic_0001>

<bundles_post_ra>
// kernel: tpu_custom_call.1
= control target key start
LH: loop header
LB: loop body
LE: loop exit
PB: predicated region body
PF: predicated region fallthrough
CT: control target
= control target key end

     0   :  { %8 = vsyncpa [#allocation3], 0  ;;  %s412_s0 = inlined_call_operand.hbm [shape: f32[16,128], index: 0, kind: input, shape index: {}]   ;;  %s413_s1 = inlined_call_operand.hbm [shape: bf16[128,128], index: 1, kind: input, shape index: {}]   ;;  %s414_s2 = inlined_call_operand.vmem [shape: f32[1,128], index: 2, kind: input, shape index: {}]   ;;  %s415_s3 = inlined_call_operand.hbm [shape: f32[16,128], index: 3, kind: output, shape index: {}]  }
   0x1   :  { %9 = vsyncpa [#allocation6], 0 }
   0x2   :  { %10 = vsyncpa [#allocation4], 0  ;;  %s338_s12 = smov [#allocation2]   ;;  %s266_s16 = scalar_lea.hbm %s412_s0, 256 }
   0x3   :  { %s16_s13 = sshll.u32 %s338_s12, 4  ;;  %p267_p0 = scmp.ne.s32.totalorder %s412_s0, %s266_s16  ;;  %s17_s13 = int_to_ptr.vmem [resolvable:$true] %s16_s13 }
   0x4   :  { %p270_p1 = scmp.lt.u32.totalorder %s266_s16, %s412_s0 }
   0x6   :  { %p272_p2 = pnand %p270_p1, %p267_p0 }
   0x8   :  { %275 = shalt.err (!%p272_p2)
}
   0x9   :  { %s276_s21 = scalar_lea.vmem %s17_s13, 256  ;;  %p281_p4 = scmp.lt.s32.totalorder %s17_s13, %s17_s13 }
   0xa   :  { %p277_p3 = scmp.ne.s32.totalorder %s17_s13, %s276_s21  ;;  %p282_p5 = scmp.lt.s32.totalorder %s276_s21, %s276_s21 }
   0xc   :  { %p283_p6 = por %p282_p5, %p281_p4 }
   0xe   :  { %p284_p7 = pnand %p283_p6, %p277_p3 }
  0x10   :  { %287 = shalt.err (!%p284_p7)
}
  0x11   :  { %s339_s22 = smov 128   ;;  %s340_s23 = smov 8  }
  0x12   :  { %22 = dma.hbm_to_vmem [thread:$0]  %s412_s0, 256, %s17_s13, [#allocation3], %s339_s22, %s339_s22, %s340_s23  }
  0x13   :  { %s341_s26 = smov [#allocation5]   ;;  %s288_s30 = scalar_lea.hbm %s413_s1, 1024 }
  0x14   :  { %s28_s27 = sshll.u32 %s341_s26, 4  ;;  %p289_p8 = scmp.ne.s32.totalorder %s413_s1, %s288_s30  ;;  %s29_s27 = int_to_ptr.vmem [resolvable:$true] %s28_s27 }
  0x15   :  { %p292_p9 = scmp.lt.u32.totalorder %s288_s30, %s413_s1 }
  0x17   :  { %p294_p10 = pnand %p292_p9, %p289_p8 }
  0x19   :  { %297 = shalt.err (!%p294_p10)
}
  0x1a   :  { %s298_s8 = scalar_lea.vmem %s29_s27, 1024  ;;  %p303_p12 = scmp.lt.s32.totalorder %s29_s27, %s29_s27 }
  0x1b   :  { %p299_p11 = scmp.ne.s32.totalorder %s29_s27, %s298_s8  ;;  %p304_p13 = scmp.lt.s32.totalorder %s298_s8, %s298_s8 }
  0x1d   :  { %p305_p0 = por %p304_p13, %p303_p12 }
  0x1f   :  { %p306_p1 = pnand %p305_p0, %p299_p11 }
  0x21   :  { %309 = shalt.err (!%p306_p1)
}
  0x22   :  { %s342_s0 = smov 64   ;;  %s343_s9 = smov 4  }
  0x23   :  { %34 = dma.hbm_to_vmem [thread:$0]  %s413_s1, 1024, %s29_s27, [#allocation6], %s342_s0, %s342_s0, %s343_s9  }
  0x24   :  { %332 = dma.done.wait [#allocation3], 256  }
  0x25   :  { %333 = vsyncadd [#allocation3], 4294967040 }
  0x26   :  { %334 = dma.done.wait [#allocation6], 1024  }
  0x27   :  { %335 = vsyncadd [#allocation6], 4294966272  ;;  %v344_v0 = vmov 0.0   ;;  %v44_v1 = vld [vmem:[#allocation2] sm:$0xff]  ;;  %v45_v2 = vld [vmem:[#allocation2 + $0x8] sm:$0xff]  ;;  %vm345_vm0 = vmmov 0  }
  0x28   :  { %225 = vmatprep.subr.bf16.mxu0 %v344_v0  ;;  %46 = vadd.xlane.f32.xlu0 %v44_v1  ;;  %v50_v3 = vmul.f32 %v44_v1, %v44_v1  ;;  %v254_v4 = vld [vmem:[#allocation5] sm:$0xff]   ;;  %v51_v5 = vmul.f32 %v45_v2, %v45_v2  ;;  %v255_v6 = vld [vmem:[#allocation5 + $0x8] sm:$0xff]   ;;  %v256_v7 = vld [vmem:[#allocation5 + $0x10] sm:$0xff]   ;;  %s346_s13 = smov [#allocation7]  }
  0x29   :  { %226 = vmatpush3.bf16.msra.mxu0 %v254_v4  ;;  %v257_v8 = vld [vmem:[#allocation5 + $0x18] sm:$0xff]   ;;  %v258_v9 = vld [vmem:[#allocation5 + $0x20] sm:$0xff]   ;;  %v259_v10 = vld [vmem:[#allocation5 + $0x28] sm:$0xff]   ;;  %241 = vmatprep.mubr.msk.bf16.mxu0 %vm345_vm0, %v344_v0  ;;  %s194_s14 = sshll.u32 %s346_s13, 4  ;;  %s195_s14 = int_to_ptr.vmem [resolvable:$true] %s194_s14 }
  0x2a   :  { %52 = vadd.xlane.f32.xlu1 %v50_v3  ;;  %227 = vmatprep.subr.bf16.mxu0 %v344_v0  ;;  %v260_v11 = vld [vmem:[#allocation5 + $0x30] sm:$0xff]   ;;  %v261_v12 = vld [vmem:[#allocation5 + $0x38] sm:$0xff]   ;;  %s310_s15 = scalar_lea.vmem %s195_s14, 256  ;;  %p315_p3 = scmp.lt.s32.totalorder %s195_s14, %s195_s14 }
  0x2b   :  { %v207_v36 = vld [vmem:[%s414_s2] ss:$0 sm:$0xff]  ;;  %p311_p2 = scmp.ne.s32.totalorder %s195_s14, %s310_s15  ;;  %p316_p4 = scmp.lt.s32.totalorder %s310_s15, %s310_s15 }
  0x2c   :  { %48 = vadd.xlane.f32.xlu0 %v45_v2 }
  0x2d   :  { %228 = vmatpush3.bf16.msra.mxu0 %v255_v6  ;;  %p317_p5 = por %p316_p4, %p315_p3 }
  0x2e   :  { %54 = vadd.xlane.f32.xlu1 %v51_v5  ;;  %229 = vmatprep.subr.bf16.mxu0 %v344_v0 }
  0x2f   :  { %p318_p6 = pnand %p317_p5, %p311_p2 }
  0x31   :  { %230 = vmatpush3.bf16.msra.mxu0 %v256_v7 }
  0x32   :  { %231 = vmatprep.subr.bf16.mxu0 %v344_v0 }
  0x35   :  { %232 = vmatpush3.bf16.msra.mxu0 %v257_v8 }
  0x36   :  { %233 = vmatprep.subr.bf16.mxu0 %v344_v0 }
  0x39   :  { %234 = vmatpush3.bf16.msra.mxu0 %v258_v9 }
  0x3a   :  { %235 = vmatprep.subr.bf16.mxu0 %v344_v0 }
  0x3d   :  { %236 = vmatpush3.bf16.msra.mxu0 %v259_v10 }
  0x3e   :  { %237 = vmatprep.subr.bf16.mxu0 %v344_v0 }
  0x41   :  { %238 = vmatpush3.bf16.msra.mxu0 %v260_v11 }
  0x42   :  { %239 = vmatprep.subr.bf16.mxu0 %v344_v0 }
  0x45   :  { %240 = vmatpush3.bf16.msra.mxu0 %v261_v12 }
  0xb5   :  { %v47_v13 = vpop.xlane.xlu0 %46 }
  0xb6   :  { %v56_v14 = vmul.f32 0.03125, %v47_v13 }
  0xb7   :  { %v53_v15 = vpop.xlane.xlu1 %52 }
  0xb8   :  { %v60_v16 = vmul.f32 %v56_v14, %v56_v14  ;;  %v58_v17 = vmul.f32 0.03125, %v53_v15  ;;  %v70_v30 = vsub.f32 %v44_v1, %v56_v14 }
  0xb9   :  { %v49_v18 = vpop.xlane.xlu0 %48 }
  0xba   :  { %v62_v19 = vsub.f32 %v58_v17, %v60_v16  ;;  %v57_v20 = vmul.f32 0.03125, %v49_v18 }
  0xbb   :  { %v55_v21 = vpop.xlane.xlu1 %54 }
  0xbc   :  { %v64_v22 = vmax.f32 %v62_v19, 0.0  ;;  %v61_v23 = vmul.f32 %v57_v20, %v57_v20  ;;  %v59_v24 = vmul.f32 0.03125, %v55_v21  ;;  %v71_v31 = vsub.f32 %v45_v2, %v57_v20 }
  0xbe   :  { %v66_v25 = vadd.f32 1e-05, %v64_v22  ;;  %v63_v26 = vsub.f32 %v59_v24, %v61_v23 }
  0xc0   :  { %v65_v27 = vmax.f32 %v63_v26, 0.0  ;;  %262 = vrsqrt.f32 %v66_v25 }
  0xc2   :  { %v67_v28 = vadd.f32 1e-05, %v65_v27 }
  0xc4   :  { %264 = vrsqrt.f32 %v67_v28 }
  0xca   :  { %v263_v29 = vpop.eup %262 }
  0xcb   :  { %v72_v33 = vmul.f32 %v263_v29, %v70_v30 }
  0xce   :  { %v265_v32 = vpop.eup %264 }
  0xcf   :  { %v73_v34 = vmul.f32 %v265_v32, %v71_v31 }
  0xd1   :  { %v74_v35 = vpack.c.bf16 %v73_v34, %v72_v33 }
  0xd3   :  { %242 = vmatmul.mubr.bf16.vlgmr.msra.gmra.mrb[0].mxu0 %v74_v35 }
 0x1a6   :  { %v180_v37 = vpop.f32.mrb[0].mxu0 }
 0x1a7   :  { %v181_v38 = vadd.f32 %v207_v36, %v180_v37  ;;  %v243_v39 = vpop.f32.mrb[1].mxu0 }
 0x1a8   :  { %v183_v40 = vpop.f32.mrb[2].mxu0 }
 0x1a9   :  { %187 = vst [vmem:[#allocation7] sm:$0xff] %v181_v38  ;;  %v184_v41 = vadd.f32 %v207_v36, %v183_v40  ;;  %v244_v42 = vpop.f32.mrb[3].mxu0 }
 0x1ab   :  { %188 = vst [vmem:[#allocation7 + $0x8] sm:$0xff] %v184_v41 }
 0x1ac   :  { %321 = shalt.err (!%p318_p6)
}
 0x1ad   :  { %s322_s17 = scalar_lea.hbm %s415_s3, 256 }
 0x1ae   :  { %p323_p7 = scmp.ne.s32.totalorder %s415_s3, %s322_s17  ;;  %p326_p8 = scmp.lt.u32.totalorder %s322_s17, %s415_s3 }
 0x1b0   :  { %p328_p9 = pnand %p326_p8, %p323_p7 }
 0x1b2   :  { %331 = shalt.err (!%p328_p9)
}
 0x1b3   :  { %200 = dma.vmem_to_hbm [thread:$0]  %s195_s14, 256, %s415_s3, [#allocation4], %s339_s22, %s339_s22, %s340_s23  }
 0x1b4   :  { %336 = dma.done.wait [#allocation4], 256  }
 0x1b5   :  { %337 = vsyncadd [#allocation4], 4294967040 }
 0x1b6   :  { %204 = vsyncpa [#allocation3], 1 }
 0x1b7   :  { %205 = vsyncpa [#allocation6], 1 }
 0x1b8   :  { %206 = vsyncpa [#allocation4], 1 }

</bundles_post_ra>
